<compile_context>
chip_gen: v7x
topology: tpu7x:2x2x1
jax: 0.10.0
libtpu: 0.0.40
codegen_flags: <defaults>
</compile_context>

<pallas_src>
import functools

import jax
import jax.numpy as jnp
from jax import lax
from jax.experimental import pallas as pl
from jax.experimental.pallas import tpu as pltpu


_LANE = 128
_MIB = 1024 * 1024


def _cdiv(a: int, b: int) -> int:
    return -(-a // b)


def _round_up(x: int, m: int) -> int:
    return ((x + m - 1) // m) * m


def _vmem_plan() -> tuple[int, int]:
    """(vmem_limit_bytes, tile_budget_bytes), per TPU generation."""
    try:
        cap = int(getattr(pltpu.get_tpu_info(), "vmem_capacity_bytes"))
    except Exception:  # query unavailable -> conservative default safe everywhere
        cap = 64 * _MIB
    if cap >= 96 * _MIB:            # v5e / v6e: 128 MiB VMEM parts
        return 100 * _MIB, 80 * _MIB
    return 48 * _MIB, 36 * _MIB     # v7x: 64 MiB physical -> leave compiler headroom


def _apply_activation(y, activation: str):
    if activation == "linear":
        return y
    if activation == "relu":
        return jnp.maximum(y, 0.0)
    if activation == "gelu":
        # PyTorch F.gelu defaults to the exact erf form (not the tanh approx).
        return jax.nn.gelu(y, approximate=False)
    if activation == "tanh":
        return jnp.tanh(y)
    if activation == "sigmoid":
        return jax.nn.sigmoid(y)
    if activation == "silu":
        return jax.nn.silu(y)
    if activation == "softplus":
        return jax.nn.softplus(y)
    if activation == "elu":
        return jax.nn.elu(y)
    if activation == "leaky_relu":
        return jax.nn.leaky_relu(y)
    # TODO(synk): remaining torch.nn.functional activation names are not mapped.
    raise NotImplementedError(f"activation {activation!r}")


def _ffn_kernel(x_ref, w_ref, b_ref, o_ref, *, activation: str, b_tile: int, precision):
    # x_ref: (b_tile, in_dim, tile_l)   -- native NCL tile
    # w_ref: (in_dim, tile_n)
    # b_ref: (1, tile_n)
    # o_ref: (b_tile, tile_l, tile_n)   -- tokens-major output tile
    w = w_ref[...]
    b = b_ref[...].astype(jnp.float32)  # pin promotion order explicitly
    for bb in range(b_tile):            # b_tile is small & static (<= 8)
        # Contract over in_dim (dim 0 of both operands) -> (tile_l, tile_n).
        y = lax.dot_general(
            x_ref[bb], w,
            dimension_numbers=(((0,), (0,)), ((), ())),
            preferred_element_type=jnp.float32,
            precision=precision,
        )
        y = _apply_activation(y + b, activation)
        o_ref[bb] = y.astype(o_ref.dtype)


def _param_spec(shape, index_map, buffers: int) -> pl.BlockSpec:
    # Grid-invariant params are single-buffered (Pallas default double-buffers
    # even constant blocks), halving their resident VMEM.
    if buffers == 1:
        try:
            return pl.BlockSpec(shape, index_map, pipeline_mode=pl.Buffered(1))
        except TypeError:  # fall back if pipeline_mode is unavailable
            pass
    return pl.BlockSpec(shape, index_map)


def _plan_tiling(n: int, in_dim: int, length: int, out_dim: int,
                 itemsize: int, budget: int):
    """Returns (b_tile, tile_l, tile_n, w_buffers)."""
    # ---- out_dim (output-channel) axis --------------------------------------
    w_full_bytes = in_dim * out_dim * itemsize
    if out_dim <= _LANE or w_full_bytes <= budget // 4:
        tile_n, w_buffers = out_dim, 1          # fully resident, single-buffered
    else:
        per_col = 2 * in_dim * itemsize         # double-buffered weight column
        tile_n = (budget // 4) // per_col // _LANE * _LANE
        tile_n = int(max(_LANE, min(tile_n, 1024)))
        w_buffers = 2
    n_tiles = _cdiv(out_dim, tile_n)
    if n_tiles == 1:
        tile_n, w_buffers = out_dim, 1

    resident = w_buffers * (in_dim + 1) * tile_n * itemsize     # weight + bias

    # ---- L (position) axis ----------------------------------------------------
    # Per-position VMEM: double-buffered x and out tiles plus the fp32 matmul /
    # activation intermediate (review: previously unaccounted).
    per_pos = 2 * in_dim * itemsize + 2 * tile_n * itemsize + tile_n * 4
    avail = max(budget - resident, per_pos)

    if length <= 512:
        tile_l = length                          # equals full dim -> always legal
    else:
        tile_l = avail // per_pos // _LANE * _LANE
        tile_l = int(max(_LANE, min(tile_l, 2048, _round_up(length, _LANE))))
        # TODO(synk): for enormous in_dim, tile the K axis with an accumulator.
    l_tiles = _cdiv(length, tile_l)

    # ---- batch axis -----------------------------------------------------------
    b_tile = 1
    if l_tiles == 1 and n > 1:
        # Small-L regime: fold several batch elements per grid step to amortize
        # the ~0.35us/step overhead and give the DMA engine bigger transfers.
        b_tile = int(min(8, n, max(1, avail // (per_pos * max(tile_l, 1)))))
        if n_tiles == 1 and n >= 2:
            # Keep >= 2 grid steps so both v7x TensorCores get work.
            b_tile = min(b_tile, max(1, n // 2))

    # ---- guarantee >= 2 grid steps for v7x megacore (neutral on 1-TC chips) ---
    if _cdiv(n, b_tile) * l_tiles * n_tiles < 2 and length >= 2 * _LANE:
        tile_l = _round_up(_cdiv(length, 2), _LANE)

    return int(b_tile), int(tile_l), int(tile_n), int(w_buffers)


def ffn_for_upper_tri(x_ncl: jax.Array, weight: jax.Array, bias: jax.Array,
                      activation: str = "linear", *, precision=None) -> jax.Array:
    """Pallas implementation of FFNForUpperTri.forward.

    Args:
      x_ncl:  (N, in_dim, L)    -- same layout as the PyTorch module input.
      weight: (out_dim, in_dim) or (out_dim, in_dim, 1) Conv1d weight.
      bias:   (out_dim,)
    Returns:
      (N, L, out_dim) -- matches PyTorch `act(conv(x)).transpose(1, 2)`.
    """
    n, in_dim, length = x_ncl.shape
    out_dim = bias.shape[0]
    itemsize = jnp.dtype(x_ncl.dtype).itemsize

    vmem_limit, budget = _vmem_plan()
    b_tile, tile_l, tile_n, w_buffers = _plan_tiling(
        n, in_dim, length, out_dim, itemsize, budget)

    # Param-side glue only (tiny arrays): W (out,in[,1]) -> (in,out); bias -> (1,out).
    w_t = jnp.transpose(weight.reshape(out_dim, in_dim), (1, 0))
    b_row = bias.reshape(1, out_dim)

    grid = (_cdiv(n, b_tile), _cdiv(length, tile_l), _cdiv(out_dim, tile_n))
    kernel = functools.partial(_ffn_kernel, activation=activation,
                               b_tile=b_tile, precision=precision)

    transcendental = activation in ("gelu", "tanh", "sigmoid", "silu", "softplus", "elu")
    cost = pl.CostEstimate(
        flops=2 * n * length * in_dim * out_dim,
        transcendentals=(n * length * out_dim) if transcendental else 0,
        bytes_accessed=int((x_ncl.size + w_t.size + b_row.size
                            + n * length * out_dim) * itemsize),
    )

    return pl.pallas_call(
        kernel,
        out_shape=jax.ShapeDtypeStruct((n, length, out_dim), x_ncl.dtype),
        grid=grid,
        in_specs=[
            # x in native (N, C, L); constant across the innermost out-dim axis,
            # so it is DMA'd once per (batch, L) tile.
            pl.BlockSpec((b_tile, in_dim, tile_l), lambda bi, li, ni: (bi, 0, li)),
            _param_spec((in_dim, tile_n), lambda bi, li, ni: (0, ni), w_buffers),
            _param_spec((1, tile_n), lambda bi, li, ni: (0, ni), w_buffers),
        ],
        out_specs=pl.BlockSpec((b_tile, tile_l, tile_n),
                               lambda bi, li, ni: (bi, li, ni)),
        compiler_params=pltpu.CompilerParams(
            dimension_semantics=("parallel", "parallel", "parallel"),
            vmem_limit_bytes=vmem_limit,
        ),
        cost_estimate=cost,
    )(x_ncl, w_t, b_row)


if __name__ == "__main__":
    # Small shapes consistent with the module: batch=2, in_dim=4, L=16, out_dim=8.
    N, IN_DIM, L, OUT_DIM = 2, 4, 16, 8

    key = jax.random.PRNGKey(0)
    kx, kw, kb = jax.random.split(key, 3)

    x = jax.random.normal(kx, (N, IN_DIM, L), dtype=jnp.float32)

    # Deterministic parameter init mirroring nn.Conv1d default (uniform +-1/sqrt(fan_in)).
    bound = 1.0 / (IN_DIM ** 0.5)
    weight = jax.random.uniform(kw, (OUT_DIM, IN_DIM), jnp.float32, -bound, bound)
    bias = jax.random.uniform(kb, (OUT_DIM,), jnp.float32, -bound, bound)

    out = ffn_for_upper_tri(x, weight, bias, activation="linear")
    out = jax.block_until_ready(out)

    # Pure-JAX reference of the PyTorch forward.
    ref = jnp.einsum("nil,oi->nlo", x, weight) + bias[None, None, :]
    assert out.shape == (N, L, OUT_DIM)
    # Tolerance documents the MXU executing f32 matmuls via bf16 passes at
    # default precision (pass precision=lax.Precision.HIGHEST for tighter match).
    max_err = float(jnp.max(jnp.abs(out - ref)))
    assert jnp.allclose(out, ref, atol=5e-2, rtol=5e-2), f"max abs err = {max_err}"

    print("KERNEL_OK")
</pallas_src>

<mosaic_0001>
module attributes {stable_mosaic.version = 11 : i64} {
  func.func @_ffn_kernel(%arg0: i32, %arg1: i32, %arg2: i32, %arg3: memref<1x4x16xf32, #tpu.memory_space<vmem>>, %arg4: memref<4x8xf32, #tpu.memory_space<vmem>>, %arg5: memref<1x8xf32, #tpu.memory_space<vmem>>, %arg6: memref<1x16x8xf32, #tpu.memory_space<vmem>>) attributes {dimension_semantics = [#tpu.dimension_semantics<parallel>, #tpu.dimension_semantics<parallel>, #tpu.dimension_semantics<parallel>], iteration_bounds = array<i64: 2, 1, 1>, scalar_prefetch = 0 : i64, scratch_operands = 0 : i64, tpu.core_type = #tpu.core_type<tc>, window_params = [{transform_indices = @transform_0, window_bounds = array<i64: 1, 4, 16>}, {pipeline_mode = #tpu.pipeline_mode<synchronous>, transform_indices = @transform_1, window_bounds = array<i64: 4, 8>}, {pipeline_mode = #tpu.pipeline_mode<synchronous>, transform_indices = @transform_2, window_bounds = array<i64: 1, 8>}, {transform_indices = @transform_3, window_bounds = array<i64: 1, 16, 8>}]} {
    %c0 = arith.constant 0 : index
    %c0_0 = arith.constant 0 : index
    %0 = vector.load %arg4[%c0, %c0_0] : memref<4x8xf32, #tpu.memory_space<vmem>>, vector<4x8xf32>
    %c0_1 = arith.constant 0 : index
    %c0_2 = arith.constant 0 : index
    %1 = vector.load %arg5[%c0_1, %c0_2] : memref<1x8xf32, #tpu.memory_space<vmem>>, vector<1x8xf32>
    %c0_3 = arith.constant 0 : index
    %c0_4 = arith.constant 0 : index
    %c0_5 = arith.constant 0 : index
    %2 = vector.load %arg3[%c0_3, %c0_4, %c0_5] : memref<1x4x16xf32, #tpu.memory_space<vmem>>, vector<1x4x16xf32>
    %3 = vector.shape_cast %2 : vector<1x4x16xf32> to vector<4x16xf32>
    %cst = arith.constant dense<0.000000e+00> : vector<16x8xf32>
    %4 = tpu.matmul %3, %0, %cst {dimension_numbers = #tpu.dot_dimension_numbers<[0], [0], [1], [1], [0, 1, 1, 1], [], []>} : vector<4x16xf32>, vector<4x8xf32>, vector<16x8xf32> -> vector<16x8xf32>
    %5 = vector.broadcast %1 : vector<1x8xf32> to vector<16x8xf32>
    %6 = arith.addf %4, %5 : vector<16x8xf32>
    %c0_6 = arith.constant 0 : index
    %c0_7 = arith.constant 0 : index
    %c0_8 = arith.constant 0 : index
    %7 = vector.load %arg6[%c0_6, %c0_7, %c0_8] : memref<1x16x8xf32, #tpu.memory_space<vmem>>, vector<1x16x8xf32>
    %8 = vector.shape_cast %7 : vector<1x16x8xf32> to vector<16x8xf32>
    %9 = vector.shape_cast %6 : vector<16x8xf32> to vector<1x16x8xf32>
    tpu.vector_store %arg6[%c0_6, %c0_7, %c0_8], %9 {strides = array<i32>} : memref<1x16x8xf32, #tpu.memory_space<vmem>>, vector<1x16x8xf32>,
    return
  }
  func.func @transform_0(%arg0: i32, %arg1: i32, %arg2: i32) -> (i32, i32, i32) {
    %c0_i32 = arith.constant 0 : i32
    %c0_i32_0 = arith.constant 0 : i32
    return %arg0, %c0_i32, %arg1 : i32, i32, i32
  }
  func.func @transform_1(%arg0: i32, %arg1: i32, %arg2: i32) -> (i32, i32) {
    %c0_i32 = arith.constant 0 : i32
    %c0_i32_0 = arith.constant 0 : i32
    return %c0_i32, %arg2 : i32, i32
  }
  func.func @transform_2(%arg0: i32, %arg1: i32, %arg2: i32) -> (i32, i32) {
    %c0_i32 = arith.constant 0 : i32
    %c0_i32_0 = arith.constant 0 : i32
    return %c0_i32, %arg2 : i32, i32
  }
  func.func @transform_3(%arg0: i32, %arg1: i32, %arg2: i32) -> (i32, i32, i32) {
    %c0_i32 = arith.constant 0 : i32
    return %arg0, %arg1, %arg2 : i32, i32, i32
  }
}

</mosaic_0001>

<bundles_post_ra>
// kernel: tpu_custom_call.1
= control target key start
LH: loop header
LB: loop body
LE: loop exit
PB: predicated region body
PF: predicated region fallthrough
CT: control target
= control target key end

     0   :  { %8 = vsyncpa [#allocation3], 0  ;;  %s920_s0 = inlined_call_operand.hbm [shape: f32[2,4,16], index: 0, kind: input, shape index: {}]   ;;  %s921_s1 = inlined_call_operand.hbm [shape: f32[4,8], index: 1, kind: input, shape index: {}]   ;;  %s922_s2 = inlined_call_operand.vmem [shape: f32[1,8], index: 2, kind: input, shape index: {}]   ;;  %s923_s3 = inlined_call_operand.vmem [shape: f32[2,16,8], index: 3, kind: output, shape index: {}]  }
   0x1   :  { %10 = vsyncpa [#allocation3 + $0x1], 0 }
   0x2   :  { %11 = vsyncpa [#allocation5], 0  ;;  %s754_s12 = smov 0   ;;  %s756_s13 = smov 0  }
   0x3   :  { %s758_s14 = smov 0   ;;  %s760_s15 = smov 0  }
   0x4   :  { %s762_s16 = smov 0   ;;  %s764_s17 = smov 0  }
   0x5 LB: > { %s523_s18 = sadd.s32 4294967295, %s730_s17   ;;  %p58_p0 = scmp.ne.s32.totalorder %s714_s13, %s710_s12  ;;  %s730_s17 = sphi %s764_s17, %s17_s17   ;;  %s726_s16 = sphi %s762_s16, %s942_s16   ;;  %s722_s15 = sphi %s760_s15, %s941_s15   ;;  %s718_s14 = sphi %s758_s14, %s940_s14   ;;  %s714_s13 = sphi %s756_s13, %s939_s13   ;;  %s710_s12 = sphi %s754_s12, %s938_s12  }
   0x6   : > { %p784_p1 = scmp.eq.s32.totalorder %s523_s18, 0  ;;  %p525_p2 = scmp.ge.s32.totalorder %s730_s17, 1 }
   0x7   : > { %p151_p3 = scmp.lt.s32.totalorder %s730_s17, 3  ;;  %s732_s22 = smov [#allocation4]  }
   0x8   : > { %s928_s19 = scalar_select %p784_p1, 1, 0 }
   0x9   : > { %p792_p4 = por %p784_p1, %p58_p0  ;;  %p796_p5 = pnand %p525_p2, %p151_p3 }
   0xa   : > { %s166_s23 = sshll.u32 %s732_s22, 4  ;;  %s36_s25 = sadd.s32 1, %s726_s16  ;;  %s167_s23 = int_to_ptr.vmem [resolvable:$true] %s166_s23 }
   0xb   : > { %s929_s20 = scalar_select %p792_p4, 1, 0 }
   0xc   : > { %s930_s21 = scalar_select %p796_p5, 1, 0 }
   0xd   : > { %p557_p6 = pneg %p796_p5  ;;  %s45_s26 = sadd.s32 1, %s718_s14 }
   0xe   : > { %p810_p8 = scmp.ge.s32.totalorder %s36_s25, 2  ;;  %s618_s30 = scalar_lea.hbm %s921_s1, 64 }
   0xf   : > { %p804_p7 = pnand %p557_p6, %p784_p1  ;;  %p619_p9 = scmp.ne.s32.totalorder %s921_s1, %s618_s30 }
  0x10   : > { %s932_s27 = scalar_select %p810_p8, 1, 0 }
  0x11   : > { %p620_p10 = pneg %p804_p7  ;;  %p625_p13 = scmp.lt.u32.totalorder %s618_s30, %s921_s1 }
  0x13   : > { %p621_p11 = pnand %p620_p10, %p619_p9 }
  0x15   : > { %p622_p12 = pneg %p621_p11 }
  0x17   : > { %p627_p0 = pnand %p625_p13, %p622_p12 }
  0x19   : > { %630 = shalt.err (!%p627_p0)
}
  0x1a   : > { %s631_s8 = scalar_lea.vmem %s167_s23, 64  ;;  %p639_p1 = scmp.lt.s32.totalorder %s167_s23, %s167_s23 }
  0x1b   : > { %p632_p2 = scmp.ne.s32.totalorder %s167_s23, %s631_s8  ;;  %p640_p4 = scmp.lt.s32.totalorder %s631_s8, %s631_s8 }
  0x1d   : > { %p634_p3 = pnand %p632_p2, %p620_p10  ;;  %p641_p5 = por %p640_p4, %p639_p1 }
  0x1f   : > { %p635_p6 = pneg %p634_p3 }
  0x21   : > { %p642_p8 = pnand %p641_p5, %p635_p6 }
  0x23   : > { %645 = shalt.err (!%p642_p8)
}
  0x24   : > { %560 = dma.hbm_to_vmem [thread:$0]  (!%p804_p7), %s921_s1, 64, %s167_s23, [#allocation5]  }
  0x25   : > { %p933_p9 = scmp.ne.s32.totalorder %s932_s27, 0  ;;  %p52_p1 = scmp.ne.s32.totalorder %s718_s14, %s714_s13 }
  0x26   : > { %p53_p4 = scmp.eq.s32.totalorder %s730_s17, 0  ;;  %p566_p5 = scmp.lt.s32.totalorder %s730_s17, 2 }
  0x27   : > { %s944_s25 = smov (%p933_p9, %s36_s25), 0  ;;  %s183_s12 = sand.u32 1, %s718_s14  }
  0x28   : > { %s40_s11 = ssub.s32 %s726_s16, %s944_s25  ;;  %p54_p10 = por %p53_p4, %p52_p1 }
  0x29   : > { %p43_p8 = scmp.eq.s32.totalorder %s40_s11, 0  ;;  %s530_s18 = sshll.u32 %s726_s16, 6 }
  0x2a   : > { %s529_s24 = sshll.u32 %s183_s12, 2  ;;  %s850_s23 = scalar_lea.hbm %s920_s0, %s530_s18 }
  0x2b   : > { %s845_s22 = scalar_select %p43_p8, %s718_s14, %s45_s26  }
  0x2c   : > { %s187_s27 = scalar_lea.vmem [#allocation2], %s529_s24  ;;  %p852_p7 = pnand %p566_p5, %p54_p10 }
  0x2d   : > { %s195_s30 = sshll.u32 %s187_s27, 4  ;;  %s184_s26 = scalar_lea.sflag [#allocation3], %s183_s12  ;;  %s856_s30 = int_to_ptr.vmem [resolvable:$true] %s195_s30 }
  0x2e   : > { %s646_s5 = scalar_lea.hbm %s850_s23, 64  ;;  %p648_p12 = pneg %p852_p7 }
  0x2f   : > { %p647_p11 = scmp.ne.s32.totalorder %s850_s23, %s646_s5  ;;  %s651_s8 = scalar_lea.hbm %s920_s0, 128 }
  0x30   : > { %p652_p2 = scmp.lt.u32.totalorder %s850_s23, %s920_s0  ;;  %p653_p3 = scmp.lt.u32.totalorder %s651_s8, %s646_s5 }
  0x31   : > { %p649_p13 = pnand %p648_p12, %p647_p11  ;;  %p655_p9 = scmp.lt.u32.totalorder %s646_s5, %s850_s23 }
  0x32   : > { %p654_p6 = por %p653_p3, %p652_p2 }
  0x33   : > { %p650_p0 = pneg %p649_p13 }
  0x34   : > { %p656_p1 = por %p655_p9, %p654_p6 }
  0x36   : > { %p657_p4 = pnand %p656_p1, %p650_p0 }
  0x38   : > { %660 = shalt.err (!%p657_p4)
}
  0x39   : > { %s661_s11 = scalar_lea.vmem %s856_s30, 64  ;;  %s733_s12 = smov [#allocation2]  }
  0x3a   : > { %p662_p5 = scmp.ne.s32.totalorder %s856_s30, %s661_s11  ;;  %s666_s18 = sshll.u32 %s733_s12, 4  ;;  %s667_s18 = int_to_ptr.vmem [resolvable:$false] %s666_s18 }
  0x3b   : > { %s668_s24 = scalar_lea.vmem %s667_s18, 128  ;;  %p669_p11 = scmp.lt.s32.totalorder %s856_s30, %s667_s18 }
  0x3c   : > { %p664_p8 = pnand %p662_p5, %p648_p12  ;;  %p670_p13 = scmp.lt.s32.totalorder %s668_s24, %s661_s11 }
  0x3e   : > { %p665_p10 = pneg %p664_p8  ;;  %p671_p2 = por %p670_p13, %p669_p11 }
  0x40   : > { %p672_p3 = pnand %p671_p2, %p665_p10 }
  0x42   : > { %675 = shalt.err (!%p672_p3)
}
  0x43   : > { %564 = dma.hbm_to_vmem [thread:$0]  (!%p852_p7), %s850_s23, 64, %s856_s30, %s184_s26  }
  0x44   : > { %p935_p0 = scmp.ne.s32.totalorder %s930_s21, 0 }
  0x45   : > { %s206_s28 = sand.u32 (!%p935_p0), 1, %s714_s13   ;;  %p936_p12 = scmp.ne.s32.totalorder (!%p935_p0), %s929_s20, 0 }
  0x46   : > { %204 = sbr.rel (%p935_p0) target bundleno = 431 (0x1af), region = 32  ;;  %s532_s29 = sshll.u32 (!%p935_p0), %s206_s28, 2 }
  0x47   : > { %s207_s27 = scalar_lea.sflag (!%p935_p0), [#allocation3], %s206_s28  ;;  %s210_s5 = scalar_lea.vmem (!%p935_p0), [#allocation2], %s532_s29 }
  0x4d   : > { %701 = dma.done.wait (%p936_p12), %s207_s27, 64  }
  0x4e   : > { %703 = vsyncadd (%p936_p12), %s207_s27, 4294967232  ;;  %p937_p6 = scmp.ne.s32.totalorder %s928_s19, 0 }
  0x50   : > { %705 = dma.done.wait (%p937_p6), [#allocation5], 64  }
  0x51   : > { %707 = vsyncadd (%p937_p6), [#allocation5], 4294967232  ;;  %v265_v0 = vld [vmem:[%s210_s5] sm:$0xf]  ;;  %v263_v1 = vld [vmem:[#allocation4] sm:$0xf] }
  0x52   : > { %272 = vxpose.xlu0.b32.start.end [1/1] (short) (narrow) %v265_v0, 16  ;;  %vm311_vm0 = vcmask 1043456   ;;  %vm304_vm1 = vcmask 31744   ;;  %p251_p7 = scmp.lt.s32.totalorder %s722_s15, 1  ;;  %v536_v4 = vld [vmem:[%s922_s2] ss:$0 sm:$0xff] }
  0x53   : > { %546 = vmatprep.subr.msk.mxu0 %vm311_vm0, %v263_v1  ;;  %vm390_vm2 = vcmask 64512  }
  0x54   : > { %547 = vmatpush3.msk.msra.mxu0 %vm311_vm0, %v263_v1  ;;  %s946_s15 = smov (!%p251_p7, %s722_s15), 1 }
  0x55   : > { %s542_s20 = sshll.u32 %s946_s15, 4 }
  0x56   : > { %s261_s4 = scalar_lea.vmem %s923_s3, %s542_s20 }
  0xd2   : > { %v288_v2 = vpop.trf.xlu0 }
  0xd3   : > { %548 = vmatprep.mubr.msk.f32.mxu0 %vm304_vm1, %v288_v2 }
  0xd6   : > { %v289_v3 = vpop.trf.xlu0 }
  0xd7   : > { %549 = vmatmul.mubr.msk.f32.vlgmr.msra.gmra.mrb[0].mxu0 %vm304_vm1, %v289_v3 }
 0x1aa   : > { %v550_v5 = vpop.f32.mrb[0].mxu0 }
 0x1ab   : > { %v387_v6 = vadd.f32 %v550_v5, %v536_v4  ;;  %v381_v7 = vpop.f32.mrb[1].mxu0 }
 0x1ac   : > { %v382_v8 = vadd.f32 %v536_v4, %v381_v7 }
 0x1ad   : > { %392 = vst.msk [vmem:[%s261_s4 + $0x8] sm:$0xff] %vm390_vm2, %v387_v6 }
 0x1ae   : > { %391 = vst.msk [vmem:[%s261_s4] sm:$0xff] %vm390_vm2, %v382_v8 }
 0x1af PF: > { %s17_s17 = sadd.s32 1, %s730_s17   ;;  %s938_s12 = smov %s714_s13 }
 0x1b0   : > { %p14_p9 = scmp.ge.s32.totalorder %s17_s17, 4   ;;  %s939_s13 = smov %s718_s14 }
 0x1b1   : > { %s940_s14 = smov %s845_s22  ;;  %s941_s15 = smov %s726_s16 }
 0x1b2   : > { %s942_s16 = smov %s944_s25  ;;  %16 = sbr.rel (!%p14_p9) target bundleno = 5 (0x5), region = 80 }
 0x1b9   :  { %429 = vsyncpa [#allocation3], 1 }
 0x1ba   :  { %431 = vsyncpa [#allocation3 + $0x1], 1 }
 0x1bb   :  { %432 = vsyncpa [#allocation5], 1 }

</bundles_post_ra>
